<compile_context>
chip_gen: v7x
topology: tpu7x:2x2x1
jax: 0.10.0
libtpu: 0.0.40
codegen_flags: <defaults>
</compile_context>

<pallas_src>
import functools

import jax
import jax.numpy as jnp
from jax.experimental import pallas as pl
from jax.experimental.pallas import tpu as pltpu


def _cavity_kernel(*refs, td, ndt, has_halo):
    if has_halo:
        epm_ref, lab_ref, nxt_ref, bw_ref, bh_ref, out_ref, s_ref = refs
    else:
        epm_ref, lab_ref, bw_ref, bh_ref, out_ref, s_ref = refs
        nxt_ref = None

    d = pl.program_id(1)
    H, W = epm_ref.shape[2], epm_ref.shape[3]

    bw = bw_ref[...]          # (W, W) bf16 banded 0/1, resident across the grid
    bh = bh_ref[...]          # (H, H) bf16 banded 0/1, resident across the grid

    def box_hw(x_bf16):
        # Exact 5x5 box sum over (H, W) with zero padding, as bf16 banded
        # matmuls on the otherwise-idle MXU.  Bit-exact: operands are 0/1 and
        # intermediate counts (<= 5, <= 25) are exactly representable in bf16;
        # accumulation is f32.
        n = x_bf16.shape[0]
        xw = jnp.dot(x_bf16.reshape(n * H, W), bw,
                     preferred_element_type=jnp.float32)
        xw = xw.reshape(n, H, W).astype(jnp.bfloat16)
        bh_b = jnp.broadcast_to(bh, (n, H, H))
        # out[n, k, w] = sum_h bh[k, h] * xw[n, h, w]
        return jax.lax.dot_general(
            bh_b, xw,
            dimension_numbers=(((2,), (1,)), ((0,), (0,))),
            preferred_element_type=jnp.float32)

    epm = epm_ref[0].astype(jnp.float32)                 # (td, H, W) EPM_s tile
    lab = lab_ref[0]                                     # (td, H, W) native dtype
    lab_f = lab.astype(jnp.float32)
    s_main = box_hw(lab.astype(jnp.bfloat16))            # (td, H, W) HW box sums

    # s_ref rows: [0,2) carry from previous tile (zero padding at d==0),
    #             [2,td+2) this tile, [td+2,td+4) next-tile halo (zero padding
    #             on the last tile).
    @pl.when(d == 0)
    def _():
        s_ref[0:2] = jnp.zeros((2, H, W), jnp.float32)
        out_ref[...] = jnp.zeros_like(out_ref)

    s_ref[2:td + 2] = s_main

    if has_halo:
        @pl.when(d != ndt - 1)
        def _():
            s_ref[td + 2:td + 4] = box_hw(nxt_ref[0].astype(jnp.bfloat16))

        @pl.when(d == ndt - 1)
        def _():
            s_ref[td + 2:td + 4] = jnp.zeros((2, H, W), jnp.float32)
    else:
        s_ref[td + 2:td + 4] = jnp.zeros((2, H, W), jnp.float32)

    # D-direction 5-tap box sum: major-axis slices only (no lane/sublane
    # relayout).  dil == dilated-label counts == Conv3d(ones,5,pad=2)(label).
    dil = (s_ref[0:td] + s_ref[1:td + 1] + s_ref[2:td + 2]
           + s_ref[3:td + 3] + s_ref[4:td + 4])

    if has_halo:
        # Carry this tile's last two box-summed rows for the next grid step.
        # Correct only because D is the innermost, sequentially iterated
        # "arbitrary" grid axis (reset at d == 0).
        s_ref[0:2] = s_main[td - 2:td]

    # (EPM*255).astype(uint8) > 0.5*255  <=>  floor(EPM*255) >= 128  <=>  EPM*255 >= 128.
    epm_m = jnp.where(epm * 255.0 >= 128.0, dil, 0.0)    # EPM_s_clone * label_dl
    # TODO(synk): skimage.measure.label (connected components) and
    # MBD.topology_error_3D are CPU graph algorithms with no Pallas equivalent;
    # the missed-foreground mask `crit` is used as the surrogate critical
    # region (it counts every missed foreground voxel).
    crit = (lab_f - epm_m) > 0.0

    # Masked BCE with nn.BCELoss's -100 clamp.  Labels are assumed strictly
    # binary {0,1}, so crit => label == 1 and a single log per element suffices.
    p = jnp.where(crit, epm, 1.0)
    bce = -jnp.maximum(jnp.log(p), -100.0)

    out_ref[...] += jnp.sum(bce, axis=0, keepdims=True)


def _tpu_vmem_bytes():
    try:
        cap = getattr(pltpu.get_tpu_info(), "vmem_capacity_bytes", None)
        if cap:
            return int(cap)
    except Exception:
        pass
    return 128 * 1024 * 1024


def _choose_td(D, H, W, epm_itemsize, lab_itemsize, budget_bytes):
    """Largest D-tile whose per-step working set fits the VMEM budget."""
    row = H * W
    # Resident / fixed: bf16 band matrices (double-buffered), halo stream
    # (double-buffered), the 4 scratch padding rows, halo temporaries.
    fixed = (4 * (W * W + H * H) * 2
             + 4 * row * lab_itemsize
             + 4 * row * 4
             + 4 * row * 4)
    # Per D-row: double-buffered epm/lab streams, one f32 scratch row, ~5 f32
    # temporaries (s_main, xw, dil, epm_m/p, bce), bf16 lab/xw copies, and the
    # (td, H, H) bf16 broadcast of the H-band.
    per_td = row * (2 * epm_itemsize + 2 * lab_itemsize + 4 + 5 * 4 + 2 * 2) + H * H * 2
    cap = max(1, (budget_bytes - fixed) // per_td)

    cands = [t for t in range(2, D, 2) if D % t == 0] + [D]
    fitting = [t for t in cands if t <= cap]
    if fitting:
        return max(fitting)
    # TODO(synk): ragged / oversized D falls back to the smallest usable tile.
    return min(cands)


def cavity_loss_pallas(pred, gt, *, td=None):
    """pred, gt: (B, 1, D, H, W); pred in [0, 1], gt a binary mask.

    Returns the scalar surrogate CavityLoss (see TODO about the topology filter).
    """
    epm = jnp.squeeze(pred, axis=1)     # (B, D, H, W), native dtype (no f32 copy)
    lab = jnp.squeeze(gt, axis=1)       # (B, D, H, W), native dtype
    B, D, H, W = epm.shape

    vmem_cap = _tpu_vmem_bytes()
    if td is None:
        td = _choose_td(D, H, W, epm.dtype.itemsize, lab.dtype.itemsize,
                        budget_bytes=int(vmem_cap * 0.40))
    if D % td != 0:
        raise ValueError(f"td={td} must divide D={D}")
    ndt = D // td
    if ndt > 1 and td % 2 != 0:
        raise ValueError(f"td={td} must be even when D={D} is tiled")
    has_halo = ndt > 1

    # Banded 0/1 matrices (|i-j| <= 2): 5-tap box sum == all-ones conv tap.
    # Built once per call, streamed as resident bf16 inputs (exact for 0/1).
    def band(n):
        r = jax.lax.broadcasted_iota(jnp.int32, (n, n), 0)
        c = jax.lax.broadcasted_iota(jnp.int32, (n, n), 1)
        return (jnp.abs(r - c) <= 2).astype(jnp.bfloat16)

    bw = band(W)
    bh = band(H)

    def _main_map(b, d):
        return (b, d, 0, 0)

    def _band_map(b, d):
        return (0, 0)

    in_specs = [pl.BlockSpec((1, td, H, W), _main_map),   # EPM_s
                pl.BlockSpec((1, td, H, W), _main_map)]   # label
    args = [epm, lab]
    if has_halo:
        n_halo_blocks = D // 2

        def _halo_map(b, d):
            # First two label rows of the next D-tile (clamped on the last tile,
            # where the data is unused -- the kernel zeroes those rows instead).
            return (b, jnp.minimum((d + 1) * (td // 2), n_halo_blocks - 1), 0, 0)

        in_specs.append(pl.BlockSpec((1, 2, H, W), _halo_map))
        args.append(lab)
    in_specs += [pl.BlockSpec((W, W), _band_map),          # bw (resident)
                 pl.BlockSpec((H, H), _band_map)]          # bh (resident)
    args += [bw, bh]

    kernel = functools.partial(_cavity_kernel, td=td, ndt=ndt, has_halo=has_halo)

    partial_sums = pl.pallas_call(
        kernel,
        out_shape=jax.ShapeDtypeStruct((B, H, W), jnp.float32),
        grid_spec=pltpu.PrefetchScalarGridSpec(
            num_scalar_prefetch=0,
            grid=(B, ndt),
            in_specs=in_specs,
            out_specs=pl.BlockSpec((1, H, W), lambda b, d: (b, 0, 0)),
            scratch_shapes=[pltpu.VMEM((td + 4, H, W), jnp.float32)],
        ),
        compiler_params=pltpu.CompilerParams(
            dimension_semantics=("parallel", "arbitrary"),
            vmem_limit_bytes=int(vmem_cap * 0.75),
        ),
    )(*args)

    return jnp.sum(partial_sums) / jnp.float32(B * D * H * W)


def cavity_loss_ref(pred, gt):
    """Pure-JAX reference of the same forward math (binary gt masks)."""
    epm = jnp.squeeze(pred, axis=1).astype(jnp.float32)
    lab = jnp.squeeze(gt, axis=1).astype(jnp.float32)
    B, D, H, W = epm.shape
    labp = jnp.pad(lab, ((0, 0), (2, 2), (2, 2), (2, 2)))
    acc = sum(labp[:, :, :, dx:dx + W] for dx in range(5))
    acc = sum(acc[:, :, dy:dy + H, :] for dy in range(5))
    dl = jnp.floor(sum(acc[:, dz:dz + D] for dz in range(5)))
    epm_bin = (jnp.floor(epm * 255.0) > 127.5).astype(jnp.float32)
    crit = ((lab - epm_bin * dl) > 0.0).astype(jnp.float32)
    epm_c = epm * crit
    lab_c = lab * crit
    log_p = jnp.maximum(jnp.log(epm_c), -100.0)
    log_1mp = jnp.maximum(jnp.log(1.0 - epm_c), -100.0)
    return jnp.mean(-(lab_c * log_p + (1.0 - lab_c) * log_1mp))


if __name__ == "__main__":
    B, D, H, W = 2, 16, 8, 128
    key = jax.random.PRNGKey(0)
    k1, k2 = jax.random.split(key)
    pred = jax.random.uniform(k1, (B, 1, D, H, W), dtype=jnp.float32,
                              minval=1e-3, maxval=1.0 - 1e-3)
    gt = (jax.random.uniform(k2, (B, 1, D, H, W)) > 0.5).astype(jnp.float32)

    ref = cavity_loss_ref(pred, gt)
    # Multi-tile path: exercises the D-halo stream, pl.when gating and the carry.
    loss_tiled = jax.block_until_ready(cavity_loss_pallas(pred, gt, td=8))
    # Auto tile selection (single-tile path, no halo stream).
    loss_auto = jax.block_until_ready(cavity_loss_pallas(pred, gt))

    for loss in (loss_tiled, loss_auto):
        assert jnp.isfinite(loss), loss
        assert abs(float(loss) - float(ref)) < 1e-4 * max(1.0, abs(float(ref))), (
            float(loss), float(ref))
    print("KERNEL_OK")
</pallas_src>

<mosaic_0001>
module attributes {stable_mosaic.version = 11 : i64} {
  func.func @_cavity_kernel(%arg0: i32, %arg1: i32, %arg2: memref<1x8x8x128xf32, #tpu.memory_space<vmem>>, %arg3: memref<1x8x8x128xf32, #tpu.memory_space<vmem>>, %arg4: memref<1x2x8x128xf32, #tpu.memory_space<vmem>>, %arg5: memref<128x128xbf16, #tpu.memory_space<vmem>>, %arg6: memref<8x8xbf16, #tpu.memory_space<vmem>>, %arg7: memref<1x8x128xf32, #tpu.memory_space<vmem>>, %arg8: memref<12x8x128xf32, #tpu.memory_space<vmem>>) attributes {dimension_semantics = [#tpu.dimension_semantics<parallel>, #tpu.dimension_semantics<arbitrary>], iteration_bounds = array<i64: 2, 2>, scalar_prefetch = 0 : i64, scratch_operands = 1 : i64, tpu.core_type = #tpu.core_type<tc>, window_params = [{transform_indices = @transform_0, window_bounds = array<i64: 1, 8, 8, 128>}, {transform_indices = @transform_1, window_bounds = array<i64: 1, 8, 8, 128>}, {transform_indices = @transform_2, window_bounds = array<i64: 1, 2, 8, 128>}, {pipeline_mode = #tpu.pipeline_mode<synchronous>, transform_indices = @transform_3, window_bounds = array<i64: 128, 128>}, {pipeline_mode = #tpu.pipeline_mode<synchronous>, transform_indices = @transform_4, window_bounds = array<i64: 8, 8>}, {transform_indices = @transform_5, window_bounds = array<i64: 1, 8, 128>}]} {
    %c0 = arith.constant 0 : index
    %c0_0 = arith.constant 0 : index
    %0 = vector.load %arg5[%c0, %c0_0] : memref<128x128xbf16, #tpu.memory_space<vmem>>, vector<128x128xbf16>
    %c0_1 = arith.constant 0 : index
    %c0_2 = arith.constant 0 : index
    %1 = vector.load %arg6[%c0_1, %c0_2] : memref<8x8xbf16, #tpu.memory_space<vmem>>, vector<8x8xbf16>
    %c0_3 = arith.constant 0 : index
    %c0_4 = arith.constant 0 : index
    %c0_5 = arith.constant 0 : index
    %c0_6 = arith.constant 0 : index
    %2 = vector.load %arg2[%c0_3, %c0_4, %c0_5, %c0_6] : memref<1x8x8x128xf32, #tpu.memory_space<vmem>>, vector<1x8x8x128xf32>
    %3 = vector.shape_cast %2 : vector<1x8x8x128xf32> to vector<8x8x128xf32>
    %c0_7 = arith.constant 0 : index
    %c0_8 = arith.constant 0 : index
    %c0_9 = arith.constant 0 : index
    %c0_10 = arith.constant 0 : index
    %4 = vector.load %arg3[%c0_7, %c0_8, %c0_9, %c0_10] : memref<1x8x8x128xf32, #tpu.memory_space<vmem>>, vector<1x8x8x128xf32>
    %5 = vector.shape_cast %4 : vector<1x8x8x128xf32> to vector<8x8x128xf32>
    %6 = arith.truncf %5 : vector<8x8x128xf32> to vector<8x8x128xbf16>
    %7 = vector.shape_cast %6 : vector<8x8x128xbf16> to vector<64x128xbf16>
    %cst = arith.constant dense<0.000000e+00> : vector<64x128xf32>
    %8 = tpu.matmul %7, %0, %cst {dimension_numbers = #tpu.dot_dimension_numbers<[1], [0], [0], [1], [0, 0, 1, 1], [], []>} : vector<64x128xbf16>, vector<128x128xbf16>, vector<64x128xf32> -> vector<64x128xf32>
    %9 = vector.shape_cast %8 : vector<64x128xf32> to vector<8x8x128xf32>
    %10 = arith.truncf %9 : vector<8x8x128xf32> to vector<8x8x128xbf16>
    %11 = vector.shape_cast %1 : vector<8x8xbf16> to vector<1x8x8xbf16>
    %12 = vector.broadcast %11 : vector<1x8x8xbf16> to vector<8x8x8xbf16>
    %cst_11 = arith.constant dense<0.000000e+00> : vector<8x8x128xf32>
    %13 = tpu.matmul %12, %10, %cst_11 {dimension_numbers = #tpu.dot_dimension_numbers<[2], [1], [1], [2], [0, 0, 0, 1, 1, 2], [0], [0]>} : vector<8x8x8xbf16>, vector<8x8x128xbf16>, vector<8x8x128xf32> -> vector<8x8x128xf32>
    %c0_i32 = arith.constant 0 : i32
    %14 = arith.cmpi eq, %arg1, %c0_i32 : i32
    %15 = arith.extui %14 : i1 to i32
    %c0_i32_12 = arith.constant 0 : i32
    %16 = arith.cmpi ne, %15, %c0_i32_12 : i32
    scf.if %16 {
      %cst_47 = arith.constant 0.000000e+00 : f32
      %56 = vector.broadcast %cst_47 : f32 to vector<2x8x128xf32>
      %c0_48 = arith.constant 0 : index
      %c0_49 = arith.constant 0 : index
      %c0_50 = arith.constant 0 : index
      %57 = vector.load %arg8[%c0_48, %c0_49, %c0_50] : memref<12x8x128xf32, #tpu.memory_space<vmem>>, vector<2x8x128xf32>
      tpu.vector_store %arg8[%c0_48, %c0_49, %c0_50], %56 {strides = array<i32>} : memref<12x8x128xf32, #tpu.memory_space<vmem>>, vector<2x8x128xf32>,
      %cst_51 = arith.constant 0.000000e+00 : f32
      %58 = vector.broadcast %cst_51 : f32 to vector<1x8x128xf32>
      %c0_52 = arith.constant 0 : index
      %c0_53 = arith.constant 0 : index
      %c0_54 = arith.constant 0 : index
      %59 = vector.load %arg7[%c0_52, %c0_53, %c0_54] : memref<1x8x128xf32, #tpu.memory_space<vmem>>, vector<1x8x128xf32>
      tpu.vector_store %arg7[%c0_52, %c0_53, %c0_54], %58 {strides = array<i32>} : memref<1x8x128xf32, #tpu.memory_space<vmem>>, vector<1x8x128xf32>,
    } else {
    }
    %c2 = arith.constant 2 : index
    %c0_13 = arith.constant 0 : index
    %c0_14 = arith.constant 0 : index
    %17 = vector.load %arg8[%c2, %c0_13, %c0_14] : memref<12x8x128xf32, #tpu.memory_space<vmem>>, vector<8x8x128xf32>
    tpu.vector_store %arg8[%c2, %c0_13, %c0_14], %13 {strides = array<i32>} : memref<12x8x128xf32, #tpu.memory_space<vmem>>, vector<8x8x128xf32>,
    %c1_i32 = arith.constant 1 : i32
    %18 = arith.cmpi ne, %arg1, %c1_i32 : i32
    %19 = arith.extui %18 : i1 to i32
    %c0_i32_15 = arith.constant 0 : i32
    %20 = arith.cmpi ne, %19, %c0_i32_15 : i32
    scf.if %20 {
      %c0_47 = arith.constant 0 : index
      %c0_48 = arith.constant 0 : index
      %c0_49 = arith.constant 0 : index
      %c0_50 = arith.constant 0 : index
      %56 = vector.load %arg4[%c0_47, %c0_48, %c0_49, %c0_50] : memref<1x2x8x128xf32, #tpu.memory_space<vmem>>, vector<1x2x8x128xf32>
      %57 = vector.shape_cast %56 : vector<1x2x8x128xf32> to vector<2x8x128xf32>
      %58 = arith.truncf %57 : vector<2x8x128xf32> to vector<2x8x128xbf16>
      %59 = vector.shape_cast %58 : vector<2x8x128xbf16> to vector<16x128xbf16>
      %cst_51 = arith.constant dense<0.000000e+00> : vector<16x128xf32>
      %60 = tpu.matmul %59, %0, %cst_51 {dimension_numbers = #tpu.dot_dimension_numbers<[1], [0], [0], [1], [0, 0, 1, 1], [], []>} : vector<16x128xbf16>, vector<128x128xbf16>, vector<16x128xf32> -> vector<16x128xf32>
      %61 = vector.shape_cast %60 : vector<16x128xf32> to vector<2x8x128xf32>
      %62 = arith.truncf %61 : vector<2x8x128xf32> to vector<2x8x128xbf16>
      %63 = vector.shape_cast %1 : vector<8x8xbf16> to vector<1x8x8xbf16>
      %64 = vector.broadcast %63 : vector<1x8x8xbf16> to vector<2x8x8xbf16>
      %cst_52 = arith.constant dense<0.000000e+00> : vector<2x8x128xf32>
      %65 = tpu.matmul %64, %62, %cst_52 {dimension_numbers = #tpu.dot_dimension_numbers<[2], [1], [1], [2], [0, 0, 0, 1, 1, 2], [0], [0]>} : vector<2x8x8xbf16>, vector<2x8x128xbf16>, vector<2x8x128xf32> -> vector<2x8x128xf32>
      %c10 = arith.constant 10 : index
      %c0_53 = arith.constant 0 : index
      %c0_54 = arith.constant 0 : index
      %66 = vector.load %arg8[%c10, %c0_53, %c0_54] : memref<12x8x128xf32, #tpu.memory_space<vmem>>, vector<2x8x128xf32>
      tpu.vector_store %arg8[%c10, %c0_53, %c0_54], %65 {strides = array<i32>} : memref<12x8x128xf32, #tpu.memory_space<vmem>>, vector<2x8x128xf32>,
    } else {
    }
    %c1_i32_16 = arith.constant 1 : i32
    %21 = arith.cmpi eq, %arg1, %c1_i32_16 : i32
    %22 = arith.extui %21 : i1 to i32
    %c0_i32_17 = arith.constant 0 : i32
    %23 = arith.cmpi ne, %22, %c0_i32_17 : i32
    scf.if %23 {
      %cst_47 = arith.constant 0.000000e+00 : f32
      %56 = vector.broadcast %cst_47 : f32 to vector<2x8x128xf32>
      %c10 = arith.constant 10 : index
      %c0_48 = arith.constant 0 : index
      %c0_49 = arith.constant 0 : index
      %57 = vector.load %arg8[%c10, %c0_48, %c0_49] : memref<12x8x128xf32, #tpu.memory_space<vmem>>, vector<2x8x128xf32>
      tpu.vector_store %arg8[%c10, %c0_48, %c0_49], %56 {strides = array<i32>} : memref<12x8x128xf32, #tpu.memory_space<vmem>>, vector<2x8x128xf32>,
    } else {
    }
    %c0_18 = arith.constant 0 : index
    %c0_19 = arith.constant 0 : index
    %c0_20 = arith.constant 0 : index
    %24 = vector.load %arg8[%c0_18, %c0_19, %c0_20] : memref<12x8x128xf32, #tpu.memory_space<vmem>>, vector<8x8x128xf32>
    %c1 = arith.constant 1 : index
    %c0_21 = arith.constant 0 : index
    %c0_22 = arith.constant 0 : index
    %25 = vector.load %arg8[%c1, %c0_21, %c0_22] : memref<12x8x128xf32, #tpu.memory_space<vmem>>, vector<8x8x128xf32>
    %26 = arith.addf %24, %25 : vector<8x8x128xf32>
    %c2_23 = arith.constant 2 : index
    %c0_24 = arith.constant 0 : index
    %c0_25 = arith.constant 0 : index
    %27 = vector.load %arg8[%c2_23, %c0_24, %c0_25] : memref<12x8x128xf32, #tpu.memory_space<vmem>>, vector<8x8x128xf32>
    %28 = arith.addf %26, %27 : vector<8x8x128xf32>
    %c3 = arith.constant 3 : index
    %c0_26 = arith.constant 0 : index
    %c0_27 = arith.constant 0 : index
    %29 = vector.load %arg8[%c3, %c0_26, %c0_27] : memref<12x8x128xf32, #tpu.memory_space<vmem>>, vector<8x8x128xf32>
    %30 = arith.addf %28, %29 : vector<8x8x128xf32>
    %c4 = arith.constant 4 : index
    %c0_28 = arith.constant 0 : index
    %c0_29 = arith.constant 0 : index
    %31 = vector.load %arg8[%c4, %c0_28, %c0_29] : memref<12x8x128xf32, #tpu.memory_space<vmem>>, vector<8x8x128xf32>
    %32 = arith.addf %30, %31 : vector<8x8x128xf32>
    %33 = vector.extract_strided_slice %13 {offsets = [6, 0, 0], sizes = [2, 8, 128], strides = [1, 1, 1]} : vector<8x8x128xf32> to vector<2x8x128xf32>
    %c0_30 = arith.constant 0 : index
    %c0_31 = arith.constant 0 : index
    %c0_32 = arith.constant 0 : index
    %34 = vector.load %arg8[%c0_30, %c0_31, %c0_32] : memref<12x8x128xf32, #tpu.memory_space<vmem>>, vector<2x8x128xf32>
    tpu.vector_store %arg8[%c0_30, %c0_31, %c0_32], %33 {strides = array<i32>} : memref<12x8x128xf32, #tpu.memory_space<vmem>>, vector<2x8x128xf32>,
    %cst_33 = arith.constant 2.550000e+02 : f32
    %35 = vector.broadcast %cst_33 : f32 to vector<8x8x128xf32>
    %36 = arith.mulf %3, %35 : vector<8x8x128xf32>
    %cst_34 = arith.constant 1.280000e+02 : f32
    %37 = vector.broadcast %cst_34 : f32 to vector<8x8x128xf32>
    %38 = arith.cmpf oge, %36, %37 : vector<8x8x128xf32>
    %cst_35 = arith.constant 0.000000e+00 : f32
    %39 = vector.broadcast %cst_35 : f32 to vector<8x8x128xf32>
    %40 = arith.select %38, %32, %39 : vector<8x8x128xi1>, vector<8x8x128xf32>
    %41 = arith.subf %5, %40 : vector<8x8x128xf32>
    %cst_36 = arith.constant 0.000000e+00 : f32
    %42 = vector.broadcast %cst_36 : f32 to vector<8x8x128xf32>
    %43 = arith.cmpf ogt, %41, %42 : vector<8x8x128xf32>
    %cst_37 = arith.constant 1.000000e+00 : f32
    %44 = vector.broadcast %cst_37 : f32 to vector<8x8x128xf32>
    %45 = arith.select %43, %3, %44 : vector<8x8x128xi1>, vector<8x8x128xf32>
    %46 = math.log %45 : vector<8x8x128xf32>
    %cst_38 = arith.constant -1.000000e+02 : f32
    %47 = vector.broadcast %cst_38 : f32 to vector<8x8x128xf32>
    %48 = arith.maximumf %46, %47 : vector<8x8x128xf32>
    %cst_39 = arith.constant 0.000000e+00 : f32
    %49 = vector.broadcast %cst_39 : f32 to vector<8x8x128xf32>
    %50 = arith.subf %49, %48 : vector<8x8x128xf32>
    %c0_40 = arith.constant 0 : index
    %c0_41 = arith.constant 0 : index
    %c0_42 = arith.constant 0 : index
    %51 = vector.load %arg7[%c0_40, %c0_41, %c0_42] : memref<1x8x128xf32, #tpu.memory_space<vmem>>, vector<1x8x128xf32>
    %cst_43 = arith.constant dense<0.000000e+00> : vector<8x128xf32>
    %52 = vector.multi_reduction <add>, %50, %cst_43 [0] : vector<8x8x128xf32> to vector<8x128xf32>
    %53 = vector.shape_cast %52 : vector<8x128xf32> to vector<1x8x128xf32>
    %54 = arith.addf %51, %53 : vector<1x8x128xf32>
    %c0_44 = arith.constant 0 : index
    %c0_45 = arith.constant 0 : index
    %c0_46 = arith.constant 0 : index
    %55 = vector.load %arg7[%c0_44, %c0_45, %c0_46] : memref<1x8x128xf32, #tpu.memory_space<vmem>>, vector<1x8x128xf32>
    tpu.vector_store %arg7[%c0_44, %c0_45, %c0_46], %54 {strides = array<i32>} : memref<1x8x128xf32, #tpu.memory_space<vmem>>, vector<1x8x128xf32>,
    return
  }
  func.func @transform_0(%arg0: i32, %arg1: i32) -> (i32, i32, i32, i32) {
    %c0_i32 = arith.constant 0 : i32
    %c0_i32_0 = arith.constant 0 : i32
    %c0_i32_1 = arith.constant 0 : i32
    return %arg0, %arg1, %c0_i32, %c0_i32_0 : i32, i32, i32, i32
  }
  func.func @transform_1(%arg0: i32, %arg1: i32) -> (i32, i32, i32, i32) {
    %c0_i32 = arith.constant 0 : i32
    %c0_i32_0 = arith.constant 0 : i32
    %c0_i32_1 = arith.constant 0 : i32
    return %arg0, %arg1, %c0_i32, %c0_i32_0 : i32, i32, i32, i32
  }
  func.func @transform_2(%arg0: i32, %arg1: i32) -> (i32, i32, i32, i32) {
    %c1_i32 = arith.constant 1 : i32
    %0 = arith.addi %arg1, %c1_i32 : i32
    %c4_i32 = arith.constant 4 : i32
    %1 = arith.muli %0, %c4_i32 : i32
    %c7_i32 = arith.constant 7 : i32
    %2 = arith.minsi %1, %c7_i32 : i32
    %c0_i32 = arith.constant 0 : i32
    %c0_i32_0 = arith.constant 0 : i32
    %c0_i32_1 = arith.constant 0 : i32
    return %arg0, %2, %c0_i32, %c0_i32_0 : i32, i32, i32, i32
  }
  func.func @transform_3(%arg0: i32, %arg1: i32) -> (i32, i32) {
    %c0_i32 = arith.constant 0 : i32
    %c0_i32_0 = arith.constant 0 : i32
    %c0_i32_1 = arith.constant 0 : i32
    return %c0_i32, %c0_i32_0 : i32, i32
  }
  func.func @transform_4(%arg0: i32, %arg1: i32) -> (i32, i32) {
    %c0_i32 = arith.constant 0 : i32
    %c0_i32_0 = arith.constant 0 : i32
    %c0_i32_1 = arith.constant 0 : i32
    return %c0_i32, %c0_i32_0 : i32, i32
  }
  func.func @transform_5(%arg0: i32, %arg1: i32) -> (i32, i32, i32) {
    %c0_i32 = arith.constant 0 : i32
    %c0_i32_0 = arith.constant 0 : i32
    %c0_i32_1 = arith.constant 0 : i32
    return %arg0, %c0_i32, %c0_i32_0 : i32, i32, i32
  }
}

</mosaic_0001>

<bundles_post_ra>
// kernel: tpu_custom_call.1
= control target key start
LH: loop header
LB: loop body
LE: loop exit
PB: predicated region body
PF: predicated region fallthrough
CT: control target
= control target key end

     0   :  { %s2829_s0 = inlined_call_operand.hbm [shape: f32[2,16,8,128], index: 0, kind: input, shape index: {}]   ;;  %s2830_s1 = inlined_call_operand.hbm [shape: f32[2,16,8,128], index: 1, kind: input, shape index: {}]   ;;  %s2831_s2 = inlined_call_operand.hbm [shape: f32[2,16,8,128], index: 2, kind: input, shape index: {}]   ;;  %s2832_s3 = inlined_call_operand.hbm [shape: bf16[128,128], index: 3, kind: input, shape index: {}]   ;;  %s2833_s4 = inlined_call_operand.hbm [shape: bf16[8,8], index: 4, kind: input, shape index: {}]   ;;  %s2834_s5 = inlined_call_operand.hbm [shape: f32[2,8,128], index: 5, kind: output, shape index: {}]  }
   0x1   :  { %2866 = sst [smem:[#allocation34_spill]] %s2830_s1 }
   0x2   :  { %2867 = sst [smem:[#allocation35_spill]] %s2832_s3 }
   0x3   :  { %2868 = sst [smem:[#allocation36_spill]] %s2834_s5 }
   0x4   :  { %10 = vsyncpa [#allocation4], 0 }
   0x5   :  { %12 = vsyncpa [#allocation4 + $0x1], 0 }
   0x6   :  { %13 = vsyncpa [#allocation7], 0 }
   0x7   :  { %15 = vsyncpa [#allocation7 + $0x1], 0 }
   0x8   :  { %16 = vsyncpa [#allocation10], 0 }
   0x9   :  { %17 = vsyncpa [#allocation5], 0 }
   0xa   :  { %19 = vsyncpa [#allocation5 + $0x1], 0  ;;  %s2185_s18 = smov 0   ;;  %s2187_s19 = smov 0  }
   0xb   :  { %s2189_s20 = smov 0   ;;  %s2191_s21 = smov 0  }
   0xc   :  { %s2193_s22 = smov 0   ;;  %s2195_s23 = smov 0  }
   0xd   :  { %s2197_s24 = smov 0   ;;  %s2199_s25 = smov 0  }
   0xe   :  { %s2201_s26 = smov 0   ;;  %s2203_s27 = smov 0  }
   0xf   :  { %s2205_s28 = smov 0   ;;  %s2207_s29 = smov 0  }
  0x10   :  { %s2209_s30 = smov 0   ;;  %s2211_s6 = smov 0  }
  0x11 LB: > { %2869 = sst [smem:[#allocation18_spill]] %s2085_s18  ;;  %s2252_s7 = sadd.s32 4294967295, %s2137_s6   ;;  %s2137_s6 = sphi %s2211_s6, %s25_s6   ;;  %s2133_s30 = sphi %s2209_s30, %s2947_s30   ;;  %s2129_s29 = sphi %s2207_s29, %s2936_s29   ;;  %s2125_s28 = sphi %s2205_s28, %s2946_s28   ;;  %s2121_s27 = sphi %s2203_s27, %s2934_s27   ;;  %s2117_s26 = sphi %s2201_s26, %s2945_s26   ;;  %s2113_s25 = sphi %s2199_s25, %s2944_s25   ;;  %s2109_s24 = sphi %s2197_s24, %s2943_s24   ;;  %s2105_s23 = sphi %s2195_s23, %s2942_s23   ;;  %s2101_s22 = sphi %s2193_s22, %s2941_s22   ;;  %s2097_s21 = sphi %s2191_s21, %s2940_s21   ;;  %s2093_s20 = sphi %s2189_s20, %s2932_s20   ;;  %s2089_s19 = sphi %s2187_s19, %s2939_s19   ;;  %s2085_s18 = sphi %s2185_s18, %s2930_s18  }
  0x12   : > { %2870 = sst [smem:[#allocation19_spill]] %s2089_s19  ;;  %s1429_s8 = sadd.s32 4294967294, %s2137_s6  }
  0x13   : > { %2871 = sst [smem:[#allocation20_spill]] %s2093_s20  ;;  %p59_p0 = scmp.ne.s32.totalorder %s2113_s25, %s2109_s24 }
  0x14   : > { %2872 = sst [smem:[#allocation21_spill]] %s2121_s27  ;;  %p2837_p1 = scmp.eq.s32.totalorder %s2252_s7, 0 }
  0x15   : > { %2873 = sst [smem:[#allocation22_spill]] %s2125_s28  ;;  %p123_p2 = scmp.ne.s32.totalorder %s2101_s22, %s2097_s21 }
  0x16   : > { %2874 = sst [smem:[#allocation23_spill]] %s2129_s29  ;;  %p2261_p3 = por %p2837_p1, %p59_p0 }
  0x17   : > { %2875 = sst [smem:[#allocation24_spill]] %s2133_s30  ;;  %p188_p4 = scmp.ne.s32.totalorder %s2093_s20, %s2089_s19 }
  0x18   : > { %2876 = sst [smem:[#allocation25_spill]] %s2252_s7  ;;  %p2269_p5 = por %p123_p2, %p2837_p1 }
  0x19   : > { %s2877_s10 = scalar_select %p2261_p3, 1, 0 }
  0x1a   : > { %s2879_s11 = scalar_select %p2269_p5, 1, 0 }
  0x1b   : > { %2878 = sst [smem:[#allocation26_spill]] %s2877_s10  ;;  %p189_p6 = scmp.eq.s32.totalorder %s2252_s7, 3 }
  0x1c   : > { %2880 = sst [smem:[#allocation27_spill]] %s2879_s11  ;;  %p194_p7 = scmp.ne.s32.totalorder %s2089_s19, %s2085_s18 }
  0x1d   : > { %p195_p8 = scmp.eq.s32.totalorder %s1429_s8, 3  ;;  %p2276_p9 = por %p189_p6, %p188_p4 }
  0x1e   : > { %p1432_p10 = scmp.ge.s32.totalorder %s2137_s6, 1  ;;  %p202_p12 = scmp.lt.s32.totalorder %s2137_s6, 5 }
  0x1f   : > { %s2881_s12 = scalar_select %p2276_p9, 1, 0 }
  0x20   : > { %p2281_p11 = por %p195_p8, %p194_p7  ;;  %p2286_p13 = pnand %p1432_p10, %p202_p12 }
  0x21   : > { %2882 = sst [smem:[#allocation28_spill]] %s2881_s12  ;;  %s2139_s15 = smov [#allocation9]  }
  0x22   : > { %s2883_s13 = scalar_select %p2281_p11, 1, 0 }
  0x23   : > { %s2885_s14 = scalar_select %p2286_p13, 1, 0 }
  0x24   : > { %2884 = sst [smem:[#allocation29_spill]] %s2883_s13  ;;  %s214_s16 = sshll.u32 %s2139_s15, 4  ;;  %s215_s16 = int_to_ptr.vmem [resolvable:$true] %s214_s16 }
  0x25   : > { %p1658_p0 = pneg %p2286_p13  ;;  %s2887_s3 = sld [smem:[#allocation35_spill]] }
  0x27   : > { %p2294_p2 = pnand %p1658_p0, %p2837_p1 }
  0x29   : > { %p2857_p6 = pneg %p2294_p2 }
  0x2b   : > { %s1833_s8 = scalar_lea.hbm %s2887_s3, 1024 }
  0x2c   : > { %p1834_p4 = scmp.ne.s32.totalorder %s2887_s3, %s1833_s8  ;;  %p1840_p10 = scmp.lt.u32.totalorder %s1833_s8, %s2887_s3 }
  0x2e   : > { %p1836_p7 = pnand %p2857_p6, %p1834_p4 }
  0x30   : > { %p1837_p8 = pneg %p1836_p7 }
  0x32   : > { %p1842_p12 = pnand %p1840_p10, %p1837_p8 }
  0x34   : > { %1845 = shalt.err (!%p1842_p12)
}
  0x35   : > { %s1846_s21 = scalar_lea.vmem %s215_s16, 1024  ;;  %p1854_p9 = scmp.lt.s32.totalorder %s215_s16, %s215_s16 }
  0x36   : > { %p1847_p0 = scmp.ne.s32.totalorder %s215_s16, %s1846_s21  ;;  %p1855_p5 = scmp.lt.s32.totalorder %s1846_s21, %s1846_s21 }
  0x38   : > { %p1849_p1 = pnand %p1847_p0, %p2857_p6  ;;  %p1856_p3 = por %p1855_p5, %p1854_p9 }
  0x3a   : > { %p1850_p11 = pneg %p1849_p1 }
  0x3c   : > { %p1857_p13 = pnand %p1856_p3, %p1850_p11 }
  0x3e   : > { %1860 = shalt.err (!%p1857_p13)
}
  0x3f   : > { %s2140_s9 = smov 64   ;;  %s2141_s18 = smov 4  }
  0x40   : > { %1661 = dma.hbm_to_vmem [thread:$0]  (!%p2294_p2), %s2887_s3, 1024, %s215_s16, [#allocation10], %s2140_s9, %s2140_s9, %s2141_s18  }
  0x41   : > { %s34_s8 = sadd.s32 1, %s2129_s29  ;;  %s37_s15 = sadd.s32 1, %s2133_s30 }
  0x42   : > { %p35_p1 = scmp.ge.s32.totalorder %s34_s8, 2  ;;  %s46_s21 = sadd.s32 1, %s2117_s26 }
  0x43   : > { %p53_p3 = scmp.ne.s32.totalorder %s2117_s26, %s2113_s25  ;;  %p2856_p5 = scmp.eq.s32.totalorder %s2137_s6, 0 }
  0x44   : > { %s2949_s8 = smov (%p35_p1, %s34_s8), 0  ;;  %s2951_s15 = smov (!%p35_p1, %s37_s15), %s2133_s30 }
  0x45   : > { %2888 = sst [smem:[#allocation30_spill]] %s2949_s8  ;;  %s42_s5 = ssub.s32 %s2129_s29, %s2949_s8 }
  0x46   : > { %p39_p9 = scmp.ge.s32.totalorder %s2951_s15, 2  ;;  %s1486_s12 = sshll.u32 %s2129_s29, 2 }
  0x47   : > { %p2334_p11 = por %p2856_p5, %p53_p3  ;;  %s1487_s9 = sadd.s32 4, %s1486_s12 }
  0x48   : > { %s2953_s15 = smov (%p39_p9, %s2951_s15), 0  ;;  %p99_p13 = scmp.lt.s32.totalorder %s1487_s9, 7 }
  0x49   : > { %2890 = sst [smem:[#allocation31_spill]] %s2953_s15  ;;  %s1488_s18 = sshll.u32 %s2949_s8, 2 }
  0x4a   : > { %s41_s13 = ssub.s32 %s2133_s30, %s2953_s15  ;;  %s1489_s24 = sadd.s32 4, %s1488_s18 }
  0x4b   : > { %s43_s3 = sor.u32 %s42_s5, %s41_s13  ;;  %p103_p4 = scmp.lt.s32.totalorder %s1489_s24, 7 }
  0x4c   : > { %p44_p7 = scmp.eq.s32.totalorder %s43_s3, 0  ;;  %p176_p8 = scmp.eq.s32.totalorder %s41_s13, 0 }
  0x4d   : > { %s2955_s9 = smov (!%p99_p13, %s1487_s9), 7  ;;  %s2957_s24 = smov (!%p103_p4, %s1489_s24), 7 }
  0x4e   : > { %s2344_s12 = scalar_select %p44_p7, %s2117_s26, %s46_s21  }
  0x4f   : > { %s2892_s28 = sadd.s32 1, %s2093_s20  ;;  %s106_s8 = ssub.s32 %s2955_s9, %s2957_s24 }
  0x50   : > { %2891 = sst [smem:[#allocation32_spill]] %s2344_s12  ;;  %p2855_p10 = scmp.lt.s32.totalorder %s2137_s6, 4 }
  0x51   : > { %s2349_s27 = scalar_select %p176_p8, %s2093_s20, %s2892_s28  }
  0x52   : > { %s2352_s15 = sor.u32 %s106_s8, %s41_s13  ;;  %s2851_s18 = sand.u32 1, %s2117_s26  }
  0x53   : > { %2893 = sst [smem:[#allocation33_spill]] %s2349_s27  ;;  %s2358_s5 = sshll.u32 %s2851_s18, 6 }
  0x54   : > { %s1437_s3 = sshll.u32 %s2129_s29, 3  ;;  %s1438_s19 = sshll.u32 %s2133_s30, 4 }
  0x55   : > { %s2362_s11 = sadd.s32 %s1438_s19, %s1437_s3  ;;  %p2368_p0 = pnand %p2855_p10, %p2334_p11 }
  0x56   : > { %s2854_s8 = sshll.u32 %s2362_s11, 7  ;;  %s262_s21 = sand.u32 1, %s2137_s6  }
  0x57   : > { %s2894_s28 = scalar_select %p2368_p0, 1, 0 }
  0x58   : > { %s2895_s1 = sld [smem:[#allocation34_spill]]  ;;  %s266_s16 = scalar_lea.vmem [#allocation6], %s2358_s5 }
  0x59   : > { %s275_s3 = sshll.u32 %s266_s16, 4  ;;  %s1446_s30 = sshll.u32 %s2955_s9, 1  ;;  %s2382_s3 = int_to_ptr.vmem [resolvable:$true] %s275_s3 }
  0x5a   : > { %s2384_s29 = sadd.s32 %s1446_s30, %s1438_s19  ;;  %s2386_s12 = scalar_lea.sflag [#allocation7], %s262_s21 }
  0x5b   : > { %p2863_p3 = pneg %p2368_p0 }
  0x5e   : > { %s2379_s18 = scalar_lea.hbm %s2895_s1, %s2854_s8  ;;  %s1866_s8 = scalar_lea.hbm %s2895_s1, 4096 }
  0x5f   : > { %s1861_s27 = scalar_lea.hbm %s2379_s18, 1024  ;;  %p1867_p13 = scmp.lt.u32.totalorder %s2379_s18, %s2895_s1 }
  0x60   : > { %p1862_p1 = scmp.ne.s32.totalorder %s2379_s18, %s1861_s27  ;;  %p1868_p4 = scmp.lt.u32.totalorder %s1866_s8, %s1861_s27 }
  0x61   : > { %p1870_p8 = scmp.lt.u32.totalorder %s1861_s27, %s2379_s18 }
  0x62   : > { %p1864_p9 = pnand %p2863_p3, %p1862_p1  ;;  %p1869_p7 = por %p1868_p4, %p1867_p13 }
  0x64   : > { %p1865_p11 = pneg %p1864_p9  ;;  %p1871_p10 = por %p1870_p8, %p1869_p7 }
  0x66   : > { %p1872_p5 = pnand %p1871_p10, %p1865_p11 }
  0x68   : > { %1875 = shalt.err (!%p1872_p5)
}
  0x69   : > { %s1876_s19 = scalar_lea.vmem %s2382_s3, 1024  ;;  %s2142_s30 = smov [#allocation6]  }
  0x6a   : > { %p1877_p1 = scmp.ne.s32.totalorder %s2382_s3, %s1876_s19  ;;  %s1881_s21 = sshll.u32 %s2142_s30, 4  ;;  %s1882_s21 = int_to_ptr.vmem [resolvable:$false] %s1881_s21 }
  0x6b   : > { %s1883_s13 = scalar_lea.vmem %s1882_s21, 2048  ;;  %p1884_p6 = scmp.lt.s32.totalorder %s2382_s3, %s1882_s21 }
  0x6c   : > { %p1879_p9 = pnand %p1877_p1, %p2863_p3  ;;  %p1885_p13 = scmp.lt.s32.totalorder %s1883_s13, %s1876_s19 }
  0x6e   : > { %p1880_p12 = pneg %p1879_p9  ;;  %p1886_p4 = por %p1885_p13, %p1884_p6 }
  0x70   : > { %p1887_p7 = pnand %p1886_p4, %p1880_p12 }
  0x72   : > { %1890 = shalt.err (!%p1887_p7)
}
  0x73   : > { %s2143_s27 = smov 128   ;;  %s2144_s8 = smov 8  }
  0x74   : > { %1671 = dma.hbm_to_vmem [thread:$0]  (!%p2368_p0), %s2379_s18, 1024, %s2382_s3, %s2386_s12, %s2143_s27, %s2143_s27, %s2144_s8  }
  0x75   : > { %s2145_s24 = smov [#allocation11]   ;;  %s2896_s9 = sshll.u32 %s2362_s11, 7 }
  0x76   : > { %s228_s16 = sshll.u32 %s2145_s24, 4  ;;  %s2422_s21 = scalar_lea.hbm %s2829_s0, %s2896_s9  ;;  %s229_s16 = int_to_ptr.vmem [resolvable:$true] %s228_s16 }
  0x77   : > { %s1891_s20 = scalar_lea.hbm %s2833_s4, 64  ;;  %p2897_p5 = pneg %p2294_p2 }
  0x78   : > { %p1892_p6 = scmp.ne.s32.totalorder %s2833_s4, %s1891_s20  ;;  %p1898_p11 = scmp.lt.u32.totalorder %s1891_s20, %s2833_s4 }
  0x7a   : > { %p1894_p10 = pnand %p1892_p6, %p2897_p5 }
  0x7c   : > { %p1895_p12 = pneg %p1894_p10 }
  0x7e   : > { %p1900_p8 = pnand %p1898_p11, %p1895_p12 }
  0x80   : > { %1903 = shalt.err (!%p1900_p8)
}
  0x81   : > { %s1904_s11 = scalar_lea.vmem %s229_s16, 64  ;;  %p2898_p9 = pmov %p2897_p5 }
  0x82   : > { %p1905_p1 = scmp.ne.s32.totalorder %s229_s16, %s1904_s11  ;;  %p1912_p7 = scmp.lt.s32.totalorder %s229_s16, %s229_s16 }
  0x83   : > { %p1913_p3 = scmp.lt.s32.totalorder %s1904_s11, %s1904_s11 }
  0x84   : > { %p1907_p13 = pnand %p1905_p1, %p2898_p9 }
  0x85   : > { %p1914_p0 = por %p1913_p3, %p1912_p7 }
  0x86   : > { %p1908_p4 = pneg %p1907_p13 }
  0x88   : > { %p1915_p5 = pnand %p1914_p0, %p1908_p4 }
  0x8a   : > { %1918 = shalt.err (!%p1915_p5)
}
  0x8b   : > { %1664 = dma.hbm_to_vmem [thread:$0]  (!%p2294_p2), %s2833_s4, 64, %s229_s16, [#allocation10]  }
  0x8c   : > { %s243_s20 = scalar_lea.vmem [#allocation3], %s2358_s5  ;;  %s2899_s24 = sand.u32 1, %s2117_s26  }
  0x8d   : > { %s252_s10 = sshll.u32 %s243_s20, 4  ;;  %s2449_s9 = scalar_lea.sflag [#allocation4], %s2899_s24  ;;  %s2445_s10 = int_to_ptr.vmem [resolvable:$true] %s252_s10 }
  0x8e   : > { %s1919_s19 = scalar_lea.hbm %s2422_s21, 1024  ;;  %p2900_p3 = scmp.ne.s32.totalorder %s2894_s28, 0 }
  0x8f   : > { %p1920_p0 = scmp.ne.s32.totalorder %s2422_s21, %s1919_s19  ;;  %s1924_s13 = scalar_lea.hbm %s2829_s0, 4096 }
  0x90   : > { %p2901_p6 = pneg %p2900_p3  ;;  %p1925_p2 = scmp.lt.u32.totalorder %s2422_s21, %s2829_s0 }
  0x91   : > { %p1926_p11 = scmp.lt.u32.totalorder %s1924_s13, %s1919_s19  ;;  %p1928_p1 = scmp.lt.u32.totalorder %s1919_s19, %s2422_s21 }
  0x92   : > { %p1922_p10 = pnand %p1920_p0, %p2901_p6 }
  0x93   : > { %p1927_p8 = por %p1926_p11, %p1925_p2 }
  0x94   : > { %p1923_p12 = pneg %p1922_p10 }
  0x95   : > { %p1929_p9 = por %p1928_p1, %p1927_p8 }
  0x97   : > { %p1930_p13 = pnand %p1929_p9, %p1923_p12 }
  0x99   : > { %1933 = shalt.err (!%p1930_p13)
}
  0x9a   : > { %s1934_s5 = scalar_lea.vmem %s2445_s10, 1024  ;;  %p2902_p7 = pmov %p2901_p6 }
  0x9b   : > { %p1935_p4 = scmp.ne.s32.totalorder %s2445_s10, %s1934_s5  ;;  %s2146_s16 = smov [#allocation3]  }
  0x9c   : > { %s1939_s11 = sshll.u32 %s2146_s16, 4  ;;  %s1940_s11 = int_to_ptr.vmem [resolvable:$false] %s1939_s11 }
  0x9d   : > { %p1937_p5 = pnand %p1935_p4, %p2902_p7  ;;  %s1941_s1 = scalar_lea.vmem %s1940_s11, 2048 }
  0x9e   : > { %p1942_p6 = scmp.lt.s32.totalorder %s2445_s10, %s1940_s11  ;;  %p1943_p10 = scmp.lt.s32.totalorder %s1941_s1, %s1934_s5 }
  0x9f   : > { %p1938_p0 = pneg %p1937_p5 }
  0xa0   : > { %p1944_p2 = por %p1943_p10, %p1942_p6 }
  0xa2   : > { %p1945_p11 = pnand %p1944_p2, %p1938_p0 }
  0xa4   : > { %1948 = shalt.err (!%p1945_p11)
}
  0xa5   : > { %1668 = dma.hbm_to_vmem [thread:$0]  (!%p2900_p3), %s2422_s21, 1024, %s2445_s10, %s2449_s9, %s2143_s27, %s2143_s27, %s2144_s8  }
  0xa6   : > { %s110_s7 = sadd.s32 1, %s2105_s23  ;;  %p117_p12 = scmp.ne.s32.totalorder %s2105_s23, %s2101_s22 }
  0xa7   : > { %p2903_p8 = scmp.eq.s32.totalorder %s2352_s15, 0  ;;  %p2904_p1 = scmp.eq.s32.totalorder %s2137_s6, 0 }
  0xa8   : > { %s287_s20 = sand.u32 1, %s2105_s23   ;;  %s1448_s19 = sshll.u32 %s2384_s29, 7 }
  0xa9   : > { %s2484_s28 = scalar_select %p2903_p8, %s2105_s23, %s110_s7  }
  0xaa   : > { %p119_p9 = por %p117_p12, %p2904_p1  ;;  %s1444_s24 = sshll.u32 %s287_s20, 4 }
  0xab   : > { %s2493_s13 = scalar_lea.hbm %s2831_s2, %s1448_s19  ;;  %s289_s21 = scalar_lea.vmem [#allocation8], %s1444_s24 }
  0xac   : > { %s302_s10 = sshll.u32 %s289_s21, 4  ;;  %p2905_p3 = scmp.lt.s32.totalorder %s2137_s6, 4  ;;  %s2501_s10 = int_to_ptr.vmem [resolvable:$true] %s302_s10 }
  0xad   : > { %s1949_s29 = scalar_lea.hbm %s2493_s13, 256  ;;  %s1954_s3 = scalar_lea.hbm %s2831_s2, 4096 }
  0xae   : > { %p2497_p13 = pnand %p2905_p3, %p119_p9  ;;  %p1950_p4 = scmp.ne.s32.totalorder %s2493_s13, %s1949_s29 }
  0xaf   : > { %p1955_p6 = scmp.lt.u32.totalorder %s2493_s13, %s2831_s2  ;;  %p1956_p10 = scmp.lt.u32.totalorder %s1954_s3, %s1949_s29 }
  0xb0   : > { %p1951_p7 = pneg %p2497_p13  ;;  %p1958_p11 = scmp.lt.u32.totalorder %s1949_s29, %s2493_s13 }
  0xb1   : > { %p1957_p2 = por %p1956_p10, %p1955_p6 }
  0xb2   : > { %p1952_p5 = pnand %p1951_p7, %p1950_p4 }
  0xb3   : > { %p1959_p12 = por %p1958_p11, %p1957_p2 }
  0xb4   : > { %p1953_p0 = pneg %p1952_p5 }
  0xb6   : > { %p1960_p8 = pnand %p1959_p12, %p1953_p0 }
  0xb8   : > { %1963 = shalt.err (!%p1960_p8)
}
  0xb9   : > { %s1964_s11 = scalar_lea.vmem %s2501_s10, 256  ;;  %s2147_s1 = smov [#allocation8]  }
  0xba   : > { %p1965_p1 = scmp.ne.s32.totalorder %s2501_s10, %s1964_s11  ;;  %s1969_s7 = sshll.u32 %s2147_s1, 4  ;;  %s1970_s7 = int_to_ptr.vmem [resolvable:$false] %s1969_s7 }
  0xbb   : > { %s1971_s20 = scalar_lea.vmem %s1970_s7, 512  ;;  %p1972_p4 = scmp.lt.s32.totalorder %s2501_s10, %s1970_s7 }
  0xbc   : > { %p1967_p9 = pnand %p1965_p1, %p1951_p7  ;;  %p1973_p5 = scmp.lt.s32.totalorder %s1971_s20, %s1964_s11 }
  0xbe   : > { %p1968_p3 = pneg %p1967_p9  ;;  %p1974_p6 = por %p1973_p5, %p1972_p4 }
  0xc0   : > { %p1975_p10 = pnand %p1974_p6, %p1968_p3 }
  0xc2   : > { %1978 = shalt.err (!%p1975_p10)
}
  0xc3   : > { %1674 = dma.hbm_to_vmem [thread:$0]  (!%p2497_p13), %s2493_s13, 256, %s2501_s10, %s2386_s12, %s2143_s27, %s2143_s27, %s2144_s8  }
  0xc4   : > { %p2907_p7 = scmp.ne.s32.totalorder %s2885_s14, 0 }
  0xc5   : > { %s2908_s24 = sld [smem:[#allocation26_spill]] (!%p2907_p7)  ;;  %s316_s19 = sand.u32 (!%p2907_p7), 1, %s2113_s25  }
  0xc6   : > { %314 = sbr.rel (%p2907_p7) target bundleno = 1308 (0x51c), region = 40  ;;  %s1450_s17 = sshll.u32 (!%p2907_p7), %s316_s19, 6 }
  0xc7   : > { %s317_s30 = scalar_lea.sflag (!%p2907_p7), [#allocation4], %s316_s19  ;;  %s320_s21 = scalar_lea.vmem (!%p2907_p7), [#allocation3], %s1450_s17 }
  0xcb   : > { %p2909_p0 = scmp.ne.s32.totalorder (!%p2907_p7), %s2908_s24, 0 }
  0xcd   : > { %2064 = dma.done.wait (%p2909_p0), %s317_s30, 1024  }
  0xce   : > { %2066 = vsyncadd (%p2909_p0), %s317_s30, 4294966272  ;;  %s2910_s15 = sld [smem:[#allocation25_spill]]  ;;  %s2540_s18 = scalar_lea.vmem [#allocation6], %s1450_s17 }
  0xd4   : > { %s325_s29 = sand.u32 1, %s2910_s15  }
  0xd5   : > { %s326_s9 = scalar_lea.sflag [#allocation7], %s325_s29 }
  0xd6   : > { %2068 = dma.done.wait (%p2909_p0), %s326_s9, 1024  }
  0xd7   : > { %2070 = vsyncadd (%p2909_p0), %s326_s9, 4294966272  ;;  %s2911_s14 = sld [smem:[#allocation27_spill]]  ;;  %s336_s12 = sand.u32 1, %s2101_s22  }
  0xd8   : > { %s2547_s27 = sshll.u32 %s336_s12, 4 }
  0xd9   : > { %s338_s8 = scalar_lea.vmem [#allocation8], %s2547_s27 }
  0xdd   : > { %p2912_p13 = scmp.ne.s32.totalorder %s2911_s14, 0 }
  0xdf   : > { %2072 = dma.done.wait (%p2912_p13), %s326_s9, 256  }
  0xe0   : > { %2074 = vsyncadd (%p2912_p13), %s326_s9, 4294967040  ;;  %p2913_p2 = scmp.eq.s32.totalorder %s2910_s15, 0 }
  0xe2   : > { %2076 = dma.done.wait (%p2913_p2), [#allocation10], 1088   ;;  %p2914_p11 = pmov %p2913_p2 }
  0xe3   : > { %s2915_s13 = sld [smem:[#allocation19_spill]]  ;;  %v2563_v0 = vld [vmem:[%s320_s21] sm:$0xff]  ;;  %v2565_v1 = vld [vmem:[%s320_s21 + $0x8] sm:$0xff]  ;;  %v2567_v2 = vld [vmem:[%s320_s21 + $0x10] sm:$0xff]  ;;  %v2148_v28 = vmov 0.0   ;;  %vm2149_vm0 = vmmov 0  }
  0xe4   : > { %2078 = vsyncadd (%p2914_p11), [#allocation10], 4294966208  ;;  %v2569_v3 = vld [vmem:[%s320_s21 + $0x18] sm:$0xff]  ;;  %v2571_v4 = vld [vmem:[%s320_s21 + $0x20] sm:$0xff]  ;;  %1562 = vmatprep.subr.bf16.mxu1 %v2148_v28  ;;  %1564 = vmatprep.mubr.msk.bf16.mxu1 %vm2149_vm0, %v2148_v28  ;;  %vm581_vm1 = vcmask 1043456   ;;  %vm577_vm2 = vcmask 64512  }
  0xe5   : > { %v2573_v5 = vld [vmem:[%s320_s21 + $0x28] sm:$0xff]  ;;  %v2575_v6 = vld [vmem:[%s320_s21 + $0x30] sm:$0xff]  ;;  %v2577_v7 = vld [vmem:[%s320_s21 + $0x38] sm:$0xff]  ;;  %s2916_s16 = sld [smem:[#allocation21_spill]] }
  0xe6   : > { %v2579_v8 = vld [vmem:[#allocation9] sm:$0xff]   ;;  %v2581_v9 = vld [vmem:[#allocation9 + $0x8] sm:$0xff]   ;;  %v2586_v10 = vld [vmem:[#allocation9 + $0x10] sm:$0xff]  }
  0xe7   : > { %1538 = vmatprep.subr.bf16.mxu0 %v2579_v8  ;;  %v2590_v11 = vld [vmem:[%s2540_s18] sm:$0xff]  ;;  %v2593_v12 = vld [vmem:[#allocation9 + $0x18] sm:$0xff]   ;;  %v2596_v13 = vld [vmem:[%s2540_s18 + $0x8] sm:$0xff] }
  0xe8   : > { %1539 = vmatpush3.bf16.msra.mxu0 %v2579_v8  ;;  %v1492_v14 = vpack.c.bf16 %v2596_v13, %v2590_v11  ;;  %v2602_v15 = vld [vmem:[#allocation9 + $0x20] sm:$0xff]   ;;  %v2606_v16 = vld [vmem:[#allocation9 + $0x28] sm:$0xff]   ;;  %v2610_v17 = vld [vmem:[#allocation9 + $0x30] sm:$0xff]  }
  0xe9   : > { %s380_s10 = sand.u32 1, %s2915_s13   ;;  %1540 = vmatprep.subr.bf16.mxu0 %v2581_v9  ;;  %v2614_v18 = vld [vmem:[#allocation9 + $0x38] sm:$0xff]   ;;  %v2618_v19 = vld [vmem:[%s2540_s18 + $0x10] sm:$0xff]  ;;  %v2625_v21 = vld [vmem:[%s2540_s18 + $0x20] sm:$0xff] }
  0xea   : > { %s2561_s3 = sshll.u32 %s380_s10, 3  ;;  %1554 = vmatprep.mubr.bf16.mxu0 %v1492_v14  ;;  %v2621_v20 = vld [vmem:[%s2540_s18 + $0x18] sm:$0xff]  ;;  %v2628_v22 = vld [vmem:[%s2540_s18 + $0x28] sm:$0xff]  ;;  %v2636_v25 = vld [vmem:[%s2540_s18 + $0x30] sm:$0xff] }
  0xeb   : > { %v1493_v23 = vpack.c.bf16 %v2621_v20, %v2618_v19  ;;  %v1494_v24 = vpack.c.bf16 %v2628_v22, %v2625_v21  ;;  %v2639_v26 = vld [vmem:[%s2540_s18 + $0x38] sm:$0xff]  ;;  %v2646_v36 = vld [vmem:[#allocation11] sm:$0xf]  ;;  %s2682_s5 = scalar_lea.vmem [#allocation12], %s2561_s3  ;;  %p1476_p12 = scmp.ne.s32.totalorder %s2916_s16, 0 }
  0xec   : > { %1541 = vmatpush3.bf16.msra.mxu0 %v2581_v9  ;;  %v1495_v27 = vpack.c.bf16 %v2639_v26, %v2636_v25 }
  0xed   : > { %1542 = vmatprep.subr.bf16.mxu0 %v2586_v10 }
  0xf0   : > { %1543 = vmatpush3.bf16.msra.mxu0 %v2586_v10 }
  0xf1   : > { %1544 = vmatprep.subr.bf16.mxu0 %v2593_v12 }
  0xf4   : > { %1545 = vmatpush3.bf16.msra.mxu0 %v2593_v12 }
  0xf5   : > { %1546 = vmatprep.subr.bf16.mxu0 %v2602_v15 }
  0xf8   : > { %1547 = vmatpush3.bf16.msra.mxu0 %v2602_v15 }
  0xf9   : > { %1548 = vmatprep.subr.bf16.mxu0 %v2606_v16 }
  0xfc   : > { %1549 = vmatpush3.bf16.msra.mxu0 %v2606_v16 }
  0xfd   : > { %1550 = vmatprep.subr.bf16.mxu0 %v2610_v17 }
 0x100   : > { %1551 = vmatpush3.bf16.msra.mxu0 %v2610_v17 }
 0x101   : > { %1552 = vmatprep.subr.bf16.mxu0 %v2614_v18 }
 0x104   : > { %1553 = vmatpush3.bf16.msra.mxu0 %v2614_v18 }
 0x105   : > { %1598 = vmatprep.subr.bf16.mxu0 %v2148_v28 }
 0x107   : > { %1555 = vmatmul.mubr.bf16.vlgmr.msra.gmra.mrb[0].mxu0 %v1493_v23 }
 0x108   : > { %1558 = vmatprep.mubr.bf16.mxu0 %v1494_v24 }
 0x10f   : > { %1559 = vmatmul.mubr.bf16.gmra.mrb[4].mxu0 %v1495_v27 }
 0x110   : > { %1600 = vmatprep.mubr.msk.bf16.mxu0 %vm2149_vm0, %v2148_v28 }
 0x1da   : > { %v1556_v29 = vpop.f32.mrb[0].mxu0 }
 0x1db   : > { %v538_v30 = vpop.f32.mrb[1].mxu0  ;;  %v571_v44 = vpack.c.bf16 %v1556_v29, %v1556_v29 }
 0x1dc   : > { %v569_v31 = vpack.c.bf16 %v538_v30, %v538_v30  ;;  %v1557_v32 = vpop.f32.mrb[2].mxu0 }
 0x1dd   : > { %v541_v33 = vpop.f32.mrb[3].mxu0  ;;  %v669_v45 = vsel %vm581_vm1, %v571_v44, 0  ;;  %v572_v46 = vpack.c.bf16 %v1557_v32, %v1557_v32 }
 0x1de   : > { %v570_v34 = vpack.c.bf16 %v541_v33, %v541_v33  ;;  %v583_v35 = vsel %vm581_vm1, %v569_v31, 0 }
 0x1df   : > { %1563 = vmatpush3.bf16.msra.mxu1 %v583_v35  ;;  %v712_v47 = vsel %vm581_vm1, %v572_v46, 0 }
 0x1e0   : > { %1568 = vmatprep.subr.bf16.mxu1 %v2148_v28  ;;  %v626_v37 = vsel %vm581_vm1, %v570_v34, 0 }
 0x1e2   : > { %1565 = vmatmul.mubr.msk.bf16.vlgmr.msra.gmra.mrb[0].mxu1 %vm577_vm2, %v2646_v36  ;;  %v1560_v38 = vpop.f32.mrb[4].mxu0 }
 0x1e3   : > { %1569 = vmatpush3.bf16.msra.mxu1 %v626_v37  ;;  %1570 = vmatprep.mubr.msk.bf16.mxu1 %vm2149_vm0, %v2148_v28  ;;  %v575_v39 = vpack.c.bf16 %v1560_v38, %v1560_v38  ;;  %v554_v40 = vpop.f32.mrb[5].mxu0 }
 0x1e4   : > { %1574 = vmatprep.subr.bf16.mxu1 %v2148_v28  ;;  %v1561_v41 = vpop.f32.mrb[6].mxu0  ;;  %v573_v48 = vpack.c.bf16 %v554_v40, %v554_v40 }
 0x1e5   : > { %v841_v42 = vsel %vm581_vm1, %v575_v39, 0  ;;  %v557_v43 = vpop.f32.mrb[7].mxu0  ;;  %v576_v52 = vpack.c.bf16 %v1561_v41, %v1561_v41 }
 0x1e6   : > { %1599 = vmatpush3.bf16.msra.mxu0 %v841_v42  ;;  %v755_v49 = vsel %vm581_vm1, %v573_v48, 0  ;;  %v574_v50 = vpack.c.bf16 %v557_v43, %v557_v43 }
 0x1e7   : > { %v884_v53 = vsel %vm581_vm1, %v576_v52, 0 }
 0x1e8   : > { %v798_v51 = vsel %vm581_vm1, %v574_v50, 0 }
 0x1e9   : > { %1601 = vmatmul.mubr.msk.bf16.vlgmr.msra.gmra.mrb[8].mxu0 %vm577_vm2, %v2646_v36 }
 0x1ea   : > { %1571 = vmatmul.mubr.msk.bf16.vlgmr.msra.gmra.mrb[4].mxu1 %vm577_vm2, %v2646_v36 }
 0x1eb   : > { %1575 = vmatpush3.bf16.msra.mxu1 %v669_v45  ;;  %1576 = vmatprep.mubr.msk.bf16.mxu1 %vm2149_vm0, %v2148_v28 }
 0x1ec   : > { %1580 = vmatprep.subr.bf16.mxu1 %v2148_v28 }
 0x1f2   : > { %1577 = vmatmul.mubr.msk.bf16.vlgmr.msra.gmra.mrb[8].mxu1 %vm577_vm2, %v2646_v36 }
 0x1f3   : > { %1581 = vmatpush3.bf16.msra.mxu1 %v712_v47  ;;  %1582 = vmatprep.mubr.msk.bf16.mxu1 %vm2149_vm0, %v2148_v28  ;;  %v2150_v47 = vmov (!%p1476_p12), 0.0  }
 0x1f4   : > { %1586 = vmatprep.subr.bf16.mxu1 %v2148_v28  ;;  %930 = vst [vmem:[#allocation2] sm:$0xff] (!%p1476_p12), %v2150_v47  ;;  %931 = vst [vmem:[#allocation2 + $0x8] sm:$0xff] (!%p1476_p12), %v2150_v47 }
 0x1f5   : > { %932 = vst [vmem:[%s2682_s5] sm:$0xff] (!%p1476_p12), %v2150_v47 }
 0x1fa   : > { %1583 = vmatmul.mubr.msk.bf16.vlgmr.msra.gmra.mrb[12].mxu1 %vm577_vm2, %v2646_v36 }
 0x1fb   : > { %1587 = vmatpush3.bf16.msra.mxu1 %v755_v49  ;;  %1588 = vmatprep.mubr.msk.bf16.mxu1 %vm2149_vm0, %v2148_v28 }
 0x1fc   : > { %1592 = vmatprep.subr.bf16.mxu1 %v2148_v28 }
 0x202   : > { %1589 = vmatmul.mubr.msk.bf16.vlgmr.msra.gmra.mrb[16].mxu1 %vm577_vm2, %v2646_v36 }
 0x203   : > { %1593 = vmatpush3.bf16.msra.mxu1 %v798_v51  ;;  %1594 = vmatprep.mubr.msk.bf16.mxu1 %vm2149_vm0, %v2148_v28 }
 0x204   : > { %1604 = vmatprep.subr.bf16.mxu1 %v2148_v28 }
 0x20a   : > { %1595 = vmatmul.mubr.msk.bf16.vlgmr.msra.gmra.mrb[20].mxu1 %vm577_vm2, %v2646_v36 }
 0x20b   : > { %1605 = vmatpush3.bf16.msra.mxu1 %v884_v53  ;;  %1606 = vmatprep.mubr.msk.bf16.mxu1 %vm2149_vm0, %v2148_v28 }
 0x212   : > { %1607 = vmatmul.mubr.msk.bf16.vlgmr.msra.gmra.mrb[24].mxu1 %vm577_vm2, %v2646_v36 }
 0x2b5   : > { %v619_v54 = vpop.f32.mrb[0].mxu1 }
 0x2b6   : > { %v1566_v55 = vpop.f32.mrb[1].mxu1 }
 0x2b7   : > { %v622_v56 = vpop.f32.mrb[2].mxu1 }
 0x2b8   : > { %v1567_v57 = vpop.f32.mrb[3].mxu1 }
 0x2bc   : > { %v2677_v58 = vpop.f32.mrb[8].mxu0 }
 0x2bd   : > { %v662_v59 = vpop.f32.mrb[4].mxu1  ;;  %v1602_v60 = vpop.f32.mrb[9].mxu0 }
 0x2be   : > { %v1572_v61 = vpop.f32.mrb[5].mxu1  ;;  %v880_v62 = vpop.f32.mrb[10].mxu0 }
 0x2bf   : > { %v665_v63 = vpop.f32.mrb[6].mxu1  ;;  %v1603_v14 = vpop.f32.mrb[11].mxu0 }
 0x2c0   : > { %v1573_v23 = vpop.f32.mrb[7].mxu1 }
 0x2c5   : > { %v705_v24 = vpop.f32.mrb[8].mxu1 }
 0x2c6   : > { %v1578_v27 = vpop.f32.mrb[9].mxu1 }
 0x2c7   : > { %v708_v29 = vpop.f32.mrb[10].mxu1 }
 0x2c8   : > { %v1579_v28 = vpop.f32.mrb[11].mxu1 }
 0x2cd   : > { %v748_v30 = vpop.f32.mrb[12].mxu1 }
 0x2ce   : > { %v1584_v31 = vpop.f32.mrb[13].mxu1 }
 0x2cf   : > { %v751_v32 = vpop.f32.mrb[14].mxu1 }
 0x2d0   : > { %v1585_v33 = vpop.f32.mrb[15].mxu1 }
 0x2d5   : > { %v791_v34 = vpop.f32.mrb[16].mxu1 }
 0x2d6   : > { %v1590_v35 = vpop.f32.mrb[17].mxu1 }
 0x2d7   : > { %v794_v37 = vpop.f32.mrb[18].mxu1 }
 0x2d8   : > { %v1591_v38 = vpop.f32.mrb[19].mxu1 }
 0x2dd   : > { %v834_v39 = vpop.f32.mrb[20].mxu1 }
 0x2de   : > { %v1596_v40 = vpop.f32.mrb[21].mxu1 }
 0x2df   : > { %v837_v41 = vpop.f32.mrb[22].mxu1 }
 0x2e0   : > { %v1597_v42 = vpop.f32.mrb[23].mxu1 }
 0x2e2   : > { %929 = sbr.rel (%p1476_p12) target bundleno = 745 (0x2e9), region = 64 }
 0x2e5   : > { %v2679_v43 = vpop.f32.mrb[24].mxu1 }
 0x2e6   : > { %v1608_v44 = vpop.f32.mrb[25].mxu1 }
 0x2e7   : > { %v923_v45 = vpop.f32.mrb[26].mxu1 }
 0x2e8   : > { %v1609_v46 = vpop.f32.mrb[27].mxu1 }
 0x2e9 PF: > { %934 = vst [vmem:[#allocation2 + $0x10] sm:$0xff] %v619_v54  ;;  %935 = vst [vmem:[#allocation2 + $0x18] sm:$0xff] %v662_v59  ;;  %s2917_s11 = sld [smem:[#allocation21_spill]] }
 0x2ea   : > { %936 = vst [vmem:[#allocation2 + $0x20] sm:$0xff] %v705_v24  ;;  %937 = vst [vmem:[#allocation2 + $0x28] sm:$0xff] %v748_v30 }
 0x2eb   : > { %938 = vst [vmem:[#allocation2 + $0x30] sm:$0xff] %v791_v34  ;;  %939 = vst [vmem:[#allocation2 + $0x38] sm:$0xff] %v834_v39 }
 0x2ec   : > { %940 = vst [vmem:[#allocation2 + $0x40] sm:$0xff] %v2677_v58  ;;  %941 = vst [vmem:[#allocation2 + $0x48] sm:$0xff] %v2679_v43 }
 0x2ef   : > { %p1477_p8 = scmp.eq.s32.totalorder %s2917_s11, 1 }
 0x2f0   : > { %v2151_v48 = vmov (!%p1477_p8), 0.0   ;;  %vm2152_vm3 = vmmov (!%p1477_p8), 0   ;;  %v947_v49 = vld [vmem:[%s338_s8 + $0x8] sm:$0xff] (!%p1477_p8) }
 0x2f1   : > { %945 = sbr.rel (%p1477_p8) target bundleno = 1226 (0x4ca), region = 68  ;;  %1610 = vmatprep.subr.bf16.mxu0 (!%p1477_p8), %v2151_v48  ;;  %1626 = vmatprep.mubr.msk.bf16.mxu0 (!%p1477_p8), %vm2152_vm3, %v2151_v48 }
 0x2f2   : > { %1611 = vmatpush3.bf16.msra.mxu0 (!%p1477_p8), %v2579_v8  ;;  %1630 = vmatprep.subr.bf16.mxu1 (!%p1477_p8), %v2151_v48  ;;  %v946_v8 = vld [vmem:[%s338_s8] sm:$0xff] (!%p1477_p8) }
 0x2f3   : > { %1612 = vmatprep.subr.bf16.mxu0 (!%p1477_p8), %v2151_v48  ;;  %1632 = vmatprep.mubr.msk.bf16.mxu1 (!%p1477_p8), %vm2152_vm3, %v2151_v48 }
 0x2f6   : > { %1613 = vmatpush3.bf16.msra.mxu0 (!%p1477_p8), %v2581_v9  ;;  %v1496_v9 = vpack.c.bf16 (!%p1477_p8), %v947_v49, %v946_v8 }
 0x2f7   : > { %1614 = vmatprep.subr.bf16.mxu0 (!%p1477_p8), %v2151_v48 }
 0x2fa   : > { %1615 = vmatpush3.bf16.msra.mxu0 %v2586_v10 }
 0x2fb   : > { %1616 = vmatprep.subr.bf16.mxu0 %v2151_v48 }
 0x2fe   : > { %1617 = vmatpush3.bf16.msra.mxu0 %v2593_v12 }
 0x2ff   : > { %1618 = vmatprep.subr.bf16.mxu0 %v2151_v48 }
 0x302   : > { %1619 = vmatpush3.bf16.msra.mxu0 %v2602_v15 }
 0x303   : > { %1620 = vmatprep.subr.bf16.mxu0 %v2151_v48 }
 0x306   : > { %1621 = vmatpush3.bf16.msra.mxu0 %v2606_v16 }
 0x307   : > { %1622 = vmatprep.subr.bf16.mxu0 %v2151_v48 }
 0x30a   : > { %1623 = vmatpush3.bf16.msra.mxu0 %v2610_v17 }
 0x30b   : > { %1624 = vmatprep.subr.bf16.mxu0 %v2151_v48 }
 0x30e   : > { %1625 = vmatpush3.bf16.msra.mxu0 %v2614_v18 }
 0x311   : > { %1627 = vmatmul.mubr.bf16.vlgmr.msra.gmra.mrb[0].mxu0 %v1496_v9 }
 0x3e4   : > { %v990_v10 = vpop.f32.mrb[0].mxu0 }
 0x3e5   : > { %v997_v12 = vpack.c.bf16 %v990_v10, %v990_v10  ;;  %v1628_v50 = vpop.f32.mrb[1].mxu0 }
 0x3e6   : > { %v993_v51 = vpop.f32.mrb[2].mxu0 }
 0x3e7   : > { %v998_v15 = vpack.c.bf16 %v993_v51, %v993_v51  ;;  %v1629_v52 = vpop.f32.mrb[3].mxu0  ;;  %v1000_v16 = vsel %vm581_vm1, %v997_v12, 0 }
 0x3e8   : > { %1631 = vmatpush3.bf16.msra.mxu1 %v1000_v16 }
 0x3e9   : > { %1636 = vmatprep.subr.bf16.mxu1 %v2151_v48  ;;  %v1043_v17 = vsel %vm581_vm1, %v998_v15, 0 }
 0x3eb   : > { %1633 = vmatmul.mubr.msk.bf16.vlgmr.msra.gmra.mrb[0].mxu1 %vm577_vm2, %v2646_v36 }
 0x3ec   : > { %1637 = vmatpush3.bf16.msra.mxu1 %v1043_v17  ;;  %1638 = vmatprep.mubr.msk.bf16.mxu1 %vm2152_vm3, %v2151_v48 }
 0x3f3   : > { %1639 = vmatmul.mubr.msk.bf16.vlgmr.msra.gmra.mrb[4].mxu1 %vm577_vm2, %v2646_v36 }
 0x4be   : > { %v1036_v18 = vpop.f32.mrb[0].mxu1 }
 0x4bf   : > { %1086 = vst [vmem:[#allocation2 + $0x50] sm:$0xff] %v1036_v18  ;;  %v1634_v53 = vpop.f32.mrb[1].mxu1 }
 0x4c0   : > { %v1039_v54 = vpop.f32.mrb[2].mxu1 }
 0x4c1   : > { %v1635_v55 = vpop.f32.mrb[3].mxu1 }
 0x4c6   : > { %v1079_v56 = vpop.f32.mrb[4].mxu1 }
 0x4c7   : > { %1087 = vst [vmem:[#allocation2 + $0x58] sm:$0xff] %v1079_v56  ;;  %v1640_v57 = vpop.f32.mrb[5].mxu1 }
 0x4c8   : > { %v1082_v59 = vpop.f32.mrb[6].mxu1 }
 0x4c9   : > { %v1641_v60 = vpop.f32.mrb[7].mxu1 }
 0x4ca PF: > { %s2918_s1 = sld [smem:[#allocation21_spill]] }
 0x4d0   : > { %p1481_p1 = scmp.ne.s32.totalorder %s2918_s1, 1 }
 0x4d1   : > { %v2153_v61 = vmov (!%p1481_p1), 0.0  }
 0x4d2   : > { %1091 = sbr.rel (%p1481_p1) target bundleno = 1241 (0x4d9), region = 72  ;;  %1093 = vst [vmem:[#allocation2 + $0x50] sm:$0xff] (!%p1481_p1), %v2153_v61  ;;  %1094 = vst [vmem:[#allocation2 + $0x58] sm:$0xff] (!%p1481_p1), %v2153_v61 }
 0x4d9 PF: > { %v1095_v62 = vld [vmem:[#allocation2] sm:$0xff]  ;;  %v1096_v36 = vld [vmem:[#allocation2 + $0x8] sm:$0xff]  ;;  %v1097_v63 = vld [vmem:[#allocation2 + $0x10] sm:$0xff]  ;;  %v1172_v14 = vmul.f32 255.0, %v2563_v0  ;;  %v1173_v23 = vmul.f32 255.0, %v2565_v1  ;;  %v1174_v24 = vmul.f32 255.0, %v2567_v2 }
 0x4da   : > { %v1098_v27 = vld [vmem:[#allocation2 + $0x18] sm:$0xff]  ;;  %v1099_v29 = vld [vmem:[#allocation2 + $0x20] sm:$0xff]  ;;  %v1100_v28 = vld [vmem:[#allocation2 + $0x28] sm:$0xff]  ;;  %v1112_v30 = vadd.f32 %v1096_v36, %v1095_v62  ;;  %v1113_v31 = vadd.f32 %v1097_v63, %v1096_v36  ;;  %v1175_v32 = vmul.f32 255.0, %v2569_v3  ;;  %v1176_v33 = vmul.f32 255.0, %v2571_v4  ;;  %1170 = vst [vmem:[#allocation2] sm:$0xff] %v2677_v58 }
 0x4db   : > { %1171 = vst [vmem:[#allocation2 + $0x8] sm:$0xff] %v2679_v43  ;;  %v1101_v34 = vld [vmem:[#allocation2 + $0x30] sm:$0xff]  ;;  %v1102_v35 = vld [vmem:[#allocation2 + $0x38] sm:$0xff]  ;;  %v1111_v37 = vld [vmem:[#allocation2 + $0x40] sm:$0xff]  ;;  %v1114_v38 = vadd.f32 %v1098_v27, %v1097_v63  ;;  %v1115_v39 = vadd.f32 %v1099_v29, %v1098_v27  ;;  %v1116_v40 = vadd.f32 %v1100_v28, %v1099_v29  ;;  %v1177_v41 = vmul.f32 255.0, %v2573_v5  ;;  %s2921_s7 = sld [smem:[#allocation22_spill]] }
 0x4dc   : > { %v1117_v42 = vadd.f32 %v1101_v34, %v1100_v28  ;;  %v1118_v44 = vadd.f32 %v1102_v35, %v1101_v34  ;;  %v1119_v45 = vadd.f32 %v1111_v37, %v1102_v35  ;;  %v1127_v46 = vld [vmem:[#allocation2 + $0x48] sm:$0xff]  ;;  %v1128_v47 = vadd.f32 %v1112_v30, %v1097_v63  ;;  %v1144_v58 = vld [vmem:[#allocation2 + $0x50] sm:$0xff]  ;;  %v1161_v17 = vld [vmem:[#allocation2 + $0x58] sm:$0xff]  ;;  %s2923_s24 = sld [smem:[#allocation28_spill]]  ;;  %s1276_s17 = sshll.u32 %s2682_s5, 4  ;;  %s2751_s17 = int_to_ptr.vmem [resolvable:$true] %s1276_s17 }
 0x4dd   : > { %v1129_v48 = vadd.f32 %v1113_v31, %v1098_v27  ;;  %v1130_v8 = vadd.f32 %v1114_v38, %v1099_v29  ;;  %v1131_v49 = vadd.f32 %v1115_v39, %v1100_v28  ;;  %v1132_v9 = vadd.f32 %v1116_v40, %v1101_v34  ;;  %s2924_s15 = sld [smem:[#allocation36_spill]]  ;;  %s1263_s9 = scalar_lea.sflag [#allocation5], %s380_s10 }
 0x4de   : > { %v1133_v10 = vadd.f32 %v1117_v42, %v1102_v35  ;;  %v1134_v43 = vadd.f32 %v1118_v44, %v1111_v37  ;;  %v1135_v12 = vadd.f32 %v1127_v46, %v1119_v45  ;;  %v1145_v50 = vadd.f32 %v1128_v47, %v1098_v27  ;;  %s1979_s18 = scalar_lea.vmem %s2751_s17, 128  ;;  %s2154_s14 = smov [#allocation12]  }
 0x4df   : > { %v1146_v51 = vadd.f32 %v1129_v48, %v1099_v29  ;;  %v1147_v15 = vadd.f32 %v1130_v8, %v1100_v28  ;;  %v1148_v52 = vadd.f32 %v1131_v49, %v1101_v34  ;;  %v1149_v16 = vadd.f32 %v1132_v9, %v1102_v35  ;;  %p1980_p9 = scmp.ne.s32.totalorder %s2751_s17, %s1979_s18  ;;  %s1983_s12 = sshll.u32 %s2154_s14, 4  ;;  %s1984_s12 = int_to_ptr.vmem [resolvable:$false] %s1983_s12 }
 0x4e0   : > { %v1150_v18 = vadd.f32 %v1133_v10, %v1111_v37  ;;  %v1151_v53 = vadd.f32 %v1134_v43, %v1127_v46  ;;  %v1152_v54 = vadd.f32 %v1144_v58, %v1135_v12  ;;  %v1162_v55 = vadd.f32 %v1145_v50, %v1099_v29  ;;  %s1985_s27 = scalar_lea.vmem %s1984_s12, 256  ;;  %p1986_p6 = scmp.lt.s32.totalorder %s2751_s17, %s1984_s12 }
 0x4e1   : > { %v1163_v56 = vadd.f32 %v1146_v51, %v1100_v28  ;;  %v1164_v57 = vadd.f32 %v1147_v15, %v1101_v34  ;;  %v1165_v59 = vadd.f32 %v1148_v52, %v1102_v35  ;;  %v1166_v60 = vadd.f32 %v1149_v16, %v1111_v37  ;;  %s1483_s19 = sshll.u32 %s2921_s7, 7  ;;  %p1987_p10 = scmp.lt.s32.totalorder %s1985_s27, %s1979_s18 }
 0x4e2   : > { %v1167_v61 = vadd.f32 %v1150_v18, %v1127_v46  ;;  %v1168_v62 = vadd.f32 %v1151_v53, %v1144_v58  ;;  %v1169_v36 = vadd.f32 %v1161_v17, %v1152_v54  ;;  %v1178_v63 = vmul.f32 255.0, %v2575_v6  ;;  %p2925_p3 = scmp.ne.s32.totalorder %s2923_s24, 0 }
 0x4e3   : > { %v1179_v27 = vmul.f32 255.0, %v2577_v7  ;;  %vm1180_vm4 = vcmp.ge.f32.partialorder %v1172_v14, 128.0  ;;  %vm1181_vm5 = vcmp.ge.f32.partialorder %v1173_v23, 128.0  ;;  %vm1182_vm6 = vcmp.ge.f32.partialorder %v1174_v24, 128.0  ;;  %s2749_s29 = scalar_lea.hbm %s2924_s15, %s1483_s19  ;;  %p1988_p7 = por %p1987_p10, %p1986_p6 }
 0x4e4   : > { %vm1183_vm7 = vcmp.ge.f32.partialorder %v1175_v32, 128.0  ;;  %vm1184_vm8 = vcmp.ge.f32.partialorder %v1176_v33, 128.0  ;;  %vm1185_vm9 = vcmp.ge.f32.partialorder %v1177_v41, 128.0  ;;  %vm1186_vm10 = vcmp.ge.f32.partialorder %v1178_v63, 128.0  ;;  %p1981_p4 = pnand %p1980_p9, %p2925_p3 }
 0x4e5   : > { %vm1187_vm11 = vcmp.ge.f32.partialorder %v1179_v27, 128.0  ;;  %v1188_v29 = vsel %vm1180_vm4, %v1162_v55, 0.0  ;;  %v1189_v28 = vsel %vm1181_vm5, %v1163_v56, 0.0  ;;  %v1190_v30 = vsel %vm1182_vm6, %v1164_v57, 0.0  ;;  %v1252_v27 = vld [vmem:[%s2682_s5] sm:$0xff] }
 0x4e6   : > { %v1191_v31 = vsel %vm1183_vm7, %v1165_v59, 0.0  ;;  %v1192_v34 = vsel %vm1184_vm8, %v1166_v60, 0.0  ;;  %v1193_v35 = vsel %vm1185_vm9, %v1167_v61, 0.0  ;;  %v1194_v37 = vsel %vm1186_vm10, %v1168_v62, 0.0  ;;  %p1982_p5 = pneg %p1981_p4 }
 0x4e7   : > { %v1195_v38 = vsel %vm1187_vm11, %v1169_v36, 0.0  ;;  %v1196_v39 = vsub.f32 %v2590_v11, %v1188_v29  ;;  %v1197_v40 = vsub.f32 %v2596_v13, %v1189_v28  ;;  %v1198_v14 = vsub.f32 %v2618_v19, %v1190_v30 }
 0x4e8   : > { %v1199_v23 = vsub.f32 %v2621_v20, %v1191_v31  ;;  %v1200_v24 = vsub.f32 %v2625_v21, %v1192_v34  ;;  %v1201_v32 = vsub.f32 %v2628_v22, %v1193_v35  ;;  %v1202_v33 = vsub.f32 %v2636_v25, %v1194_v37  ;;  %p1989_p0 = pnand %p1988_p7, %p1982_p5 }
 0x4e9   : > { %vm1204_vm12 = vcmp.gt.f32.partialorder %v1196_v39, 0.0  ;;  %vm1205_vm13 = vcmp.gt.f32.partialorder %v1197_v40, 0.0  ;;  %vm1206_vm14 = vcmp.gt.f32.partialorder %v1198_v14, 0.0  ;;  %v1203_v41 = vsub.f32 %v2639_v26, %v1195_v38 }
 0x4ea   : > { %vm1207_vm15 = vcmp.gt.f32.partialorder %v1199_v23, 0.0  ;;  %vm2729_vm0 = vcmp.gt.f32.partialorder %v1200_v24, 0.0  ;;  %v1212_v13 = vsel %vm1204_vm12, %v2563_v0, 1.0  ;;  %v1213_v19 = vsel %vm1205_vm13, %v2565_v1, 1.0 }
 0x4eb   : > { %vm1209_vm1 = vcmp.gt.f32.partialorder %v1201_v32, 0.0  ;;  %v1214_v20 = vsel %vm1206_vm14, %v2567_v2, 1.0  ;;  %vm1210_vm2 = vcmp.gt.f32.partialorder %v1202_v33, 0.0  ;;  %v1215_v21 = vsel %vm1207_vm15, %v2569_v3, 1.0 }
 0x4ec   : > { %1817 = vlog2.f32 %v1212_v13  ;;  %vm1211_vm3 = vcmp.gt.f32.partialorder %v1203_v41, 0.0  ;;  %v1216_v22 = vsel %vm2729_vm0, %v2571_v4, 1.0  ;;  %v1217_v25 = vsel %vm1209_vm1, %v2573_v5, 1.0 }
 0x4ed   : > { %1819 = vlog2.f32 %v1213_v19  ;;  %v1218_v0 = vsel %vm1210_vm2, %v2575_v6, 1.0  ;;  %v1219_v1 = vsel %vm1211_vm3, %v2577_v7, 1.0 }
 0x4ee   : > { %1821 = vlog2.f32 %v1214_v20 }
 0x4ef   : > { %1823 = vlog2.f32 %v1215_v21 }
 0x4f0   : > { %1825 = vlog2.f32 %v1216_v22 }
 0x4f1   : > { %1827 = vlog2.f32 %v1217_v25 }
 0x4f2   : > { %1829 = vlog2.f32 %v1218_v0 }
 0x4f3   : > { %1831 = vlog2.f32 %v1219_v1 }
 0x4f6   : > { %v1818_v2 = vpop.eup %1817 }
 0x4f7   : > { %v1820_v3 = vpop.eup %1819  ;;  %v1221_v26 = vmul.f32 0.6931472, %v1818_v2 }
 0x4f8   : > { %v1822_v42 = vpop.eup %1821  ;;  %v1223_v44 = vmul.f32 0.6931472, %v1820_v3 }
 0x4f9   : > { %v1824_v45 = vpop.eup %1823  ;;  %v1225_v4 = vmul.f32 0.6931472, %v1822_v42  ;;  %v1236_v46 = vmax.f32 %v1221_v26, -100.0 }
 0x4fa   : > { %v1826_v47 = vpop.eup %1825  ;;  %v1227_v5 = vmul.f32 0.6931472, %v1824_v45  ;;  %v1237_v48 = vmax.f32 %v1223_v44, -100.0 }
 0x4fb   : > { %v1828_v8 = vpop.eup %1827  ;;  %v1229_v6 = vmul.f32 0.6931472, %v1826_v47  ;;  %v1238_v49 = vmax.f32 %v1225_v4, -100.0  ;;  %v1244_v9 = vsub.f32 0.0, %v1236_v46 }
 0x4fc   : > { %v1830_v7 = vpop.eup %1829  ;;  %v1231_v58 = vmul.f32 0.6931472, %v1828_v8  ;;  %v1239_v10 = vmax.f32 %v1227_v5, -100.0  ;;  %v1245_v43 = vsub.f32 0.0, %v1237_v48 }
 0x4fd   : > { %v1832_v12 = vpop.eup %1831  ;;  %v1233_v50 = vmul.f32 0.6931472, %v1830_v7  ;;  %v1240_v51 = vmax.f32 %v1229_v6, -100.0  ;;  %v1246_v15 = vsub.f32 0.0, %v1238_v49 }
 0x4fe   : > { %v1235_v52 = vmul.f32 0.6931472, %v1832_v12  ;;  %v1241_v16 = vmax.f32 %v1231_v58, -100.0  ;;  %v1247_v17 = vsub.f32 0.0, %v1239_v10  ;;  %v1253_v18 = vadd.f32 %v1245_v43, %v1244_v9 }
 0x4ff   : > { %v1242_v53 = vmax.f32 %v1233_v50, -100.0  ;;  %v1248_v54 = vsub.f32 0.0, %v1240_v51 }
 0x500   : > { %v1254_v55 = vadd.f32 %v1253_v18, %v1246_v15  ;;  %v1243_v56 = vmax.f32 %v1235_v52, -100.0  ;;  %v1249_v57 = vsub.f32 0.0, %v1241_v16 }
 0x501   : > { %v1250_v60 = vsub.f32 0.0, %v1242_v53 }
 0x502   : > { %v1255_v59 = vadd.f32 %v1254_v55, %v1247_v17  ;;  %v1251_v62 = vsub.f32 0.0, %v1243_v56 }
 0x504   : > { %v1256_v61 = vadd.f32 %v1255_v59, %v1248_v54 }
 0x506   : > { %v1257_v36 = vadd.f32 %v1256_v61, %v1249_v57 }
 0x508   : > { %v1258_v63 = vadd.f32 %v1257_v36, %v1250_v60 }
 0x50a   : > { %v1259_v29 = vadd.f32 %v1258_v63, %v1251_v62 }
 0x50c   : > { %v1260_v28 = vadd.f32 %v1259_v29, %v1252_v27 }
 0x50e   : > { %1261 = vst [vmem:[%s2682_s5] sm:$0xff] %v1260_v28 }
 0x50f   : > { %1992 = shalt.err (!%p1989_p0)
}
 0x510   : > { %s1993_s8 = scalar_lea.hbm %s2749_s29, 128  ;;  %s1997_s3 = scalar_lea.hbm %s2924_s15, 256 }
 0x511   : > { %p1994_p13 = scmp.ne.s32.totalorder %s2749_s29, %s1993_s8  ;;  %p1998_p12 = scmp.lt.u32.totalorder %s2749_s29, %s2924_s15 }
 0x512   : > { %p1999_p8 = scmp.lt.u32.totalorder %s1997_s3, %s1993_s8  ;;  %p2001_p9 = scmp.lt.u32.totalorder %s1993_s8, %s2749_s29 }
 0x513   : > { %p1995_p2 = pnand %p1994_p13, %p2925_p3 }
 0x514   : > { %p2000_p1 = por %p1999_p8, %p1998_p12 }
 0x515   : > { %p1996_p11 = pneg %p1995_p2 }
 0x516   : > { %p2002_p4 = por %p2001_p9, %p2000_p1 }
 0x518   : > { %p2003_p5 = pnand %p2002_p4, %p1996_p11 }
 0x51a   : > { %2006 = shalt.err (!%p2003_p5)
}
 0x51b   : > { %1656 = dma.vmem_to_hbm [thread:$0]  (%p2925_p3), %s2751_s17, 128, %s2749_s29, %s1263_s9  }
 0x51c PF: > { %s2926_s11 = sld [smem:[#allocation18_spill]]  ;;  %s2927_s1 = sld [smem:[#allocation29_spill]] }
 0x51d   : > { %p1684_p6 = scmp.ge.s32.totalorder %s2137_s6, 2 }
 0x522   : > { %s1288_s7 = sand.u32 1, %s2926_s11   ;;  %p2928_p10 = scmp.ne.s32.totalorder %s2927_s1, 0 }
 0x523   : > { %s1289_s20 = scalar_lea.sflag [#allocation5], %s1288_s7 }
 0x524   : > { %p1676_p7 = pnand %p1684_p6, %p2928_p10 }
 0x526   : > { %2080 = dma.done.wait (!%p1676_p7), %s1289_s20, 128  }
 0x527   : > { %2082 = vsyncadd (!%p1676_p7), %s1289_s20, 4294967168  ;;  %s25_s6 = sadd.s32 1, %s2137_s6   ;;  %s2930_s18 = sld [smem:[#allocation19_spill]] }
 0x528   : > { %p2782_p0 = scmp.ge.s32.totalorder %s25_s6, 6   ;;  %s2931_s24 = sld [smem:[#allocation20_spill]] }
 0x529   : > { %s2932_s20 = sld [smem:[#allocation33_spill]]  ;;  %s2933_s17 = sld [smem:[#allocation32_spill]] }
 0x52a   : > { %s2934_s27 = sld [smem:[#allocation23_spill]]  ;;  %s2935_s30 = sld [smem:[#allocation24_spill]] }
 0x52b   : > { %s2936_s29 = sld [smem:[#allocation30_spill]]  ;;  %s2937_s9 = sld [smem:[#allocation31_spill]] }
 0x52c   : > { %s2940_s21 = smov %s2101_s22  ;;  %s2941_s22 = smov %s2105_s23 }
 0x52d   : > { %s2942_s23 = smov %s2484_s28  ;;  %24 = sbr.rel (!%p2782_p0) target bundleno = 17 (0x11), region = 135 }
 0x52e   : > { %s2939_s19 = smov %s2931_s24  ;;  %s2943_s24 = smov %s2113_s25 }
 0x52f   : > { %s2944_s25 = smov %s2117_s26  ;;  %s2945_s26 = smov %s2933_s17 }
 0x530   : > { %s2946_s28 = smov %s2935_s30 }
 0x531   : > { %s2947_s30 = smov %s2937_s9 }
 0x534   :  { %1294 = vsyncpa [#allocation4], 1 }
 0x535   :  { %1296 = vsyncpa [#allocation4 + $0x1], 1 }
 0x536   :  { %1297 = vsyncpa [#allocation7], 1 }
 0x537   :  { %1299 = vsyncpa [#allocation7 + $0x1], 1 }
 0x538   :  { %1300 = vsyncpa [#allocation10], 1 }
 0x539   :  { %1301 = vsyncpa [#allocation5], 1 }
 0x53a   :  { %1303 = vsyncpa [#allocation5 + $0x1], 1 }

</bundles_post_ra>
